<compile_context>
chip_gen: v6e
topology: v6e:2x2x1
jax: 0.10.0
libtpu: 0.0.40
codegen_flags: <defaults>
</compile_context>

<pallas_src>
import functools

import jax
import jax.numpy as jnp
from jax.experimental import pallas as pl
from jax.experimental.pallas import tpu as pltpu


def _round_up(x, m):
    return ((x + m - 1) // m) * m


def _cdiv(a, b):
    return -(-a // b)


def _gelu_tanh(x):
    # GELU with tanh approximation (matches torch.nn.GELU(approximate='tanh')).
    c = 0.7978845608028654  # sqrt(2/pi)
    return 0.5 * x * (1.0 + jnp.tanh(c * (x + 0.044715 * x * x * x)))


def _mlp_kernel_resident(x_ref, w1_ref, b1_ref, w2_ref, b2_ref, o_ref):
    """Weights fully VMEM-resident; one token tile per grid step.

    x_ref:  (tm, C)    input tokens (native dtype, fed straight to the MXU)
    w1_ref: (C, H)     full c_fc weight (resident across the grid)
    b1_ref: (1, H)     c_fc bias (f32)
    w2_ref: (H, C)     full c_proj weight (resident across the grid)
    b2_ref: (1, C)     c_proj bias (f32)
    o_ref:  (tm, C)    output tile
    """
    hid = jnp.dot(x_ref[...], w1_ref[...], preferred_element_type=jnp.float32)
    g = _gelu_tanh(hid + b1_ref[...])
    out = jnp.dot(g.astype(w2_ref.dtype), w2_ref[...],
                  preferred_element_type=jnp.float32)
    o_ref[...] = (out + b2_ref[...]).astype(o_ref.dtype)


def _mlp_kernel_htiled(x_ref, w1_ref, b1_ref, w2_ref, b2_ref, o_ref, acc_ref):
    """Hidden-dimension-tiled fallback with an f32 accumulator.

    Grid = (token tiles, hidden tiles); hidden is the last ("arbitrary") axis.
    """
    h_idx = pl.program_id(1)

    @pl.when(h_idx == 0)
    def _():
        acc_ref[...] = jnp.zeros_like(acc_ref)

    hid = jnp.dot(x_ref[...], w1_ref[...], preferred_element_type=jnp.float32)
    g = _gelu_tanh(hid + b1_ref[...])
    acc_ref[...] += jnp.dot(g.astype(w2_ref.dtype), w2_ref[...],
                            preferred_element_type=jnp.float32)

    @pl.when(h_idx == pl.num_programs(1) - 1)
    def _():
        o_ref[...] = (acc_ref[...] + b2_ref[...]).astype(o_ref.dtype)


@functools.partial(jax.jit, static_argnames=("tm", "th", "path"))
def mlp_forward(x, w1, b1, w2, b2, *, tm=512, th=2048, path="auto"):
    """Fused GPT-MLP forward: gelu_tanh(x @ w1 + b1) @ w2 + b2.

    x:  (B, T, C)
    w1: (C, H)   (= c_fc.weight.T),   b1: (H,)
    w2: (H, C)   (= c_proj.weight.T), b2: (C,)
    path: "auto" | "resident" | "tiled"
    """
    B, T, C = x.shape
    H = w1.shape[1]
    M = B * T
    dtype = x.dtype
    itemsize = jnp.dtype(dtype).itemsize
    w_item = jnp.dtype(w1.dtype).itemsize
    sub = 8 if itemsize >= 4 else 16  # sublane granularity (f32 vs bf16)

    C_pad = _round_up(C, 128)
    H_128 = _round_up(H, 128)
    M_sub = _round_up(M, sub)

    # Token tile: cap at M, sublane aligned; prefer >= 2 tiles so both v7x
    # TensorCores get work under dimension_semantics=("parallel", ...).
    tm_eff = _round_up(min(tm, M_sub), sub)
    if M_sub // tm_eff < 2 and M_sub >= 2 * sub:
        tm_eff = _round_up(_cdiv(M_sub, 2), sub)

    # Generation-aware VMEM budget (v5e/v6e: 128 MiB, v7x: 64 MiB per TC).
    try:
        vmem_cap = int(pltpu.get_tpu_info().vmem_capacity_bytes)
    except Exception:
        vmem_cap = 64 * 1024 * 1024  # conservative fallback (v7x-sized)
    vmem_budget = int(vmem_cap * 0.85)

    def resident_bytes(tm_e):
        # Conservative: weights counted double-buffered; includes the (tm, H)
        # f32 hidden intermediate plus its cast copy for the second matmul.
        wts = 2 * (2 * C_pad * H_128 * w_item + (H_128 + C_pad) * 4)
        xio = 2 * (tm_e * C_pad * itemsize) * 2      # x + out tiles, x2 buffers
        hid = tm_e * H_128 * (4 + w_item)
        return wts + xio + hid

    def tiled_bytes(tm_e, th_e):
        per = 2 * (tm_e * C_pad * itemsize           # x tile
                   + C_pad * th_e * w_item           # W1 slice
                   + th_e * C_pad * w_item           # W2 slice
                   + (th_e + C_pad) * 4              # bias slices
                   + tm_e * C_pad * itemsize)        # out tile
        per += tm_e * C_pad * 4                      # f32 accumulator
        per += tm_e * th_e * (4 + w_item)            # hidden intermediate + cast
        return per

    tm_res = tm_eff
    while tm_res > sub and resident_bytes(tm_res) > vmem_budget:
        tm_res = _round_up(tm_res // 2, sub)
    resident_fits = resident_bytes(tm_res) <= vmem_budget
    use_resident = (path == "resident") or (path == "auto" and resident_fits)

    if use_resident:
        tm_eff = tm_res
        H_pad = H_128
        M_pad = _round_up(M_sub, tm_eff)
        grid = (M_pad // tm_eff,)
        kernel = _mlp_kernel_resident
        in_specs = [
            pl.BlockSpec((tm_eff, C_pad), lambda i: (i, 0)),   # x tile
            pl.BlockSpec((C_pad, H_pad), lambda i: (0, 0)),    # W1 (resident)
            pl.BlockSpec((1, H_pad), lambda i: (0, 0)),        # b1
            pl.BlockSpec((H_pad, C_pad), lambda i: (0, 0)),    # W2 (resident)
            pl.BlockSpec((1, C_pad), lambda i: (0, 0)),        # b2
        ]
        out_specs = pl.BlockSpec((tm_eff, C_pad), lambda i: (i, 0))
        scratch_shapes = ()
        dim_sem = ("parallel",)
        weight_passes = 1
    else:
        th_eff = _round_up(min(th, H_128), 128)
        while th_eff > 128 and tiled_bytes(tm_eff, th_eff) > vmem_budget:
            th_eff = _round_up(th_eff // 2, 128)
        while tm_eff > sub and tiled_bytes(tm_eff, th_eff) > vmem_budget:
            tm_eff = _round_up(tm_eff // 2, sub)
        H_pad = _round_up(H_128, th_eff)
        M_pad = _round_up(M_sub, tm_eff)
        grid = (M_pad // tm_eff, H_pad // th_eff)
        kernel = _mlp_kernel_htiled
        in_specs = [
            pl.BlockSpec((tm_eff, C_pad), lambda i, h: (i, 0)),   # x tile
            pl.BlockSpec((C_pad, th_eff), lambda i, h: (0, h)),   # W1 slice
            pl.BlockSpec((1, th_eff), lambda i, h: (0, h)),       # b1 slice
            pl.BlockSpec((th_eff, C_pad), lambda i, h: (h, 0)),   # W2 slice
            pl.BlockSpec((1, C_pad), lambda i, h: (0, 0)),        # b2
        ]
        out_specs = pl.BlockSpec((tm_eff, C_pad), lambda i, h: (i, 0))
        scratch_shapes = (pltpu.VMEM((tm_eff, C_pad), jnp.float32),)
        dim_sem = ("parallel", "arbitrary")
        weight_passes = grid[0]

    # Zero-pad operands so every BlockSpec is lane/sublane aligned. Padded
    # rows/columns contribute zeros to the matmuls and are sliced off below.
    xm = x.reshape(M, C)
    if (M_pad, C_pad) != (M, C):
        xm = jnp.pad(xm, ((0, M_pad - M), (0, C_pad - C)))
    w1p = w1 if (C_pad, H_pad) == (C, H) else jnp.pad(
        w1, ((0, C_pad - C), (0, H_pad - H)))
    w2p = w2 if (H_pad, C_pad) == (H, C) else jnp.pad(
        w2, ((0, H_pad - H), (0, C_pad - C)))
    b1p = jnp.pad(b1.astype(jnp.float32), (0, H_pad - H)).reshape(1, H_pad)
    b2p = jnp.pad(b2.astype(jnp.float32), (0, C_pad - C)).reshape(1, C_pad)

    # Advisory cost estimate for the XLA scheduler.
    cost = pl.CostEstimate(
        flops=4 * M_pad * C_pad * H_pad,
        transcendentals=M_pad * H_pad,
        bytes_accessed=(xm.size * itemsize
                        + weight_passes * (w1p.size + w2p.size) * w_item
                        + (b1p.size + b2p.size) * 4
                        + M_pad * C_pad * itemsize),
    )

    out = pl.pallas_call(
        kernel,
        out_shape=jax.ShapeDtypeStruct((M_pad, C_pad), dtype),
        grid=grid,
        in_specs=in_specs,
        out_specs=out_specs,
        scratch_shapes=scratch_shapes,
        compiler_params=pltpu.CompilerParams(
            dimension_semantics=dim_sem,
            vmem_limit_bytes=vmem_budget),
        cost_estimate=cost,
    )(xm, w1p, b1p, w2p, b2p)

    return out[:M, :C].reshape(B, T, C)


def reference_mlp(x, w1, b1, w2, b2):
    h = jnp.einsum("btc,ch->bth", x.astype(jnp.float32),
                   w1.astype(jnp.float32)) + b1.astype(jnp.float32)
    g = _gelu_tanh(h)
    y = jnp.einsum("bth,hc->btc", g, w2.astype(jnp.float32)) \
        + b2.astype(jnp.float32)
    return y


if __name__ == "__main__":
    # Small GPT-style config: batch=2, seq=8, n_embd=128 -> hidden=512.
    B, T, C = 2, 8, 128
    H = 4 * C

    key = jax.random.PRNGKey(0)
    kx, k1, kb1, k2, kb2 = jax.random.split(key, 5)

    x = jax.random.normal(kx, (B, T, C), dtype=jnp.float32)

    # nn.Linear-style init: U(-1/sqrt(fan_in), +1/sqrt(fan_in)).
    s1 = 1.0 / (C ** 0.5)
    s2 = 1.0 / (H ** 0.5)
    w1 = jax.random.uniform(k1, (C, H), jnp.float32, -s1, s1)   # c_fc.weight.T
    b1 = jax.random.uniform(kb1, (H,), jnp.float32, -s1, s1)    # c_fc.bias
    w2 = jax.random.uniform(k2, (H, C), jnp.float32, -s2, s2)   # c_proj.weight.T
    b2 = jax.random.uniform(kb2, (C,), jnp.float32, -s2, s2)    # c_proj.bias

    y_ref = reference_mlp(x, w1, b1, w2, b2)

    # Default (auto) path: weights VMEM-resident.
    y = jax.block_until_ready(mlp_forward(x, w1, b1, w2, b2))
    assert y.shape == (B, T, C)
    assert jnp.allclose(y, y_ref, atol=1e-4, rtol=1e-4), "resident path mismatch"

    # Hidden-tiled fallback path (forced; exercises the accumulator kernel).
    y_t = jax.block_until_ready(
        mlp_forward(x, w1, b1, w2, b2, th=256, path="tiled"))
    assert jnp.allclose(y_t, y_ref, atol=1e-4, rtol=1e-4), "tiled path mismatch"

    # bf16 activations/weights (mixed precision: f32 accumulation inside).
    xb = x.astype(jnp.bfloat16)
    w1b = w1.astype(jnp.bfloat16)
    w2b = w2.astype(jnp.bfloat16)
    y_b = jax.block_until_ready(mlp_forward(xb, w1b, b1, w2b, b2))
    assert jnp.allclose(y_b.astype(jnp.float32), y_ref, atol=0.1, rtol=0.1), \
        "bf16 path mismatch"

    print("KERNEL_OK")
</pallas_src>

<mosaic_0001>
module attributes {stable_mosaic.version = 11 : i64} {
  func.func @_mlp_kernel_resident(%arg0: i32, %arg1: memref<8x128xf32, #tpu.memory_space<vmem>>, %arg2: memref<128x512xf32, #tpu.memory_space<vmem>>, %arg3: memref<1x512xf32, #tpu.memory_space<vmem>>, %arg4: memref<512x128xf32, #tpu.memory_space<vmem>>, %arg5: memref<1x128xf32, #tpu.memory_space<vmem>>, %arg6: memref<8x128xf32, #tpu.memory_space<vmem>>) attributes {dimension_semantics = [#tpu.dimension_semantics<parallel>], iteration_bounds = array<i64: 2>, scalar_prefetch = 0 : i64, scratch_operands = 0 : i64, tpu.core_type = #tpu.core_type<tc>, window_params = [{transform_indices = @transform_0, window_bounds = array<i64: 8, 128>}, {pipeline_mode = #tpu.pipeline_mode<synchronous>, transform_indices = @transform_1, window_bounds = array<i64: 128, 512>}, {pipeline_mode = #tpu.pipeline_mode<synchronous>, transform_indices = @transform_2, window_bounds = array<i64: 1, 512>}, {pipeline_mode = #tpu.pipeline_mode<synchronous>, transform_indices = @transform_3, window_bounds = array<i64: 512, 128>}, {pipeline_mode = #tpu.pipeline_mode<synchronous>, transform_indices = @transform_4, window_bounds = array<i64: 1, 128>}, {transform_indices = @transform_5, window_bounds = array<i64: 8, 128>}]} {
    %c0 = arith.constant 0 : index
    %c0_0 = arith.constant 0 : index
    %0 = vector.load %arg1[%c0, %c0_0] : memref<8x128xf32, #tpu.memory_space<vmem>>, vector<8x128xf32>
    %c0_1 = arith.constant 0 : index
    %c0_2 = arith.constant 0 : index
    %1 = vector.load %arg2[%c0_1, %c0_2] : memref<128x512xf32, #tpu.memory_space<vmem>>, vector<128x512xf32>
    %cst = arith.constant dense<0.000000e+00> : vector<8x512xf32>
    %2 = tpu.matmul %0, %1, %cst {dimension_numbers = #tpu.dot_dimension_numbers<[1], [0], [0], [1], [0, 0, 1, 1], [], []>} : vector<8x128xf32>, vector<128x512xf32>, vector<8x512xf32> -> vector<8x512xf32>
    %c0_3 = arith.constant 0 : index
    %c0_4 = arith.constant 0 : index
    %3 = vector.load %arg3[%c0_3, %c0_4] : memref<1x512xf32, #tpu.memory_space<vmem>>, vector<1x512xf32>
    %4 = vector.broadcast %3 : vector<1x512xf32> to vector<8x512xf32>
    %5 = arith.addf %2, %4 : vector<8x512xf32>
    %cst_5 = arith.constant 5.000000e-01 : f32
    %6 = vector.broadcast %cst_5 : f32 to vector<8x512xf32>
    %7 = arith.mulf %6, %5 : vector<8x512xf32>
    %cst_6 = arith.constant 4.471500e-02 : f32
    %8 = vector.broadcast %cst_6 : f32 to vector<8x512xf32>
    %9 = arith.mulf %8, %5 : vector<8x512xf32>
    %10 = arith.mulf %9, %5 : vector<8x512xf32>
    %11 = arith.mulf %10, %5 : vector<8x512xf32>
    %12 = arith.addf %5, %11 : vector<8x512xf32>
    %cst_7 = arith.constant 0.797884583 : f32
    %13 = vector.broadcast %cst_7 : f32 to vector<8x512xf32>
    %14 = arith.mulf %13, %12 : vector<8x512xf32>
    %15 = math.tanh %14 : vector<8x512xf32>
    %cst_8 = arith.constant 1.000000e+00 : f32
    %16 = vector.broadcast %cst_8 : f32 to vector<8x512xf32>
    %17 = arith.addf %16, %15 : vector<8x512xf32>
    %18 = arith.mulf %7, %17 : vector<8x512xf32>
    %c0_9 = arith.constant 0 : index
    %c0_10 = arith.constant 0 : index
    %19 = vector.load %arg4[%c0_9, %c0_10] : memref<512x128xf32, #tpu.memory_space<vmem>>, vector<512x128xf32>
    %cst_11 = arith.constant dense<0.000000e+00> : vector<8x128xf32>
    %20 = tpu.matmul %18, %19, %cst_11 {dimension_numbers = #tpu.dot_dimension_numbers<[1], [0], [0], [1], [0, 0, 1, 1], [], []>} : vector<8x512xf32>, vector<512x128xf32>, vector<8x128xf32> -> vector<8x128xf32>
    %c0_12 = arith.constant 0 : index
    %c0_13 = arith.constant 0 : index
    %21 = vector.load %arg5[%c0_12, %c0_13] : memref<1x128xf32, #tpu.memory_space<vmem>>, vector<1x128xf32>
    %22 = vector.broadcast %21 : vector<1x128xf32> to vector<8x128xf32>
    %23 = arith.addf %20, %22 : vector<8x128xf32>
    %c0_14 = arith.constant 0 : index
    %c0_15 = arith.constant 0 : index
    %24 = vector.load %arg6[%c0_14, %c0_15] : memref<8x128xf32, #tpu.memory_space<vmem>>, vector<8x128xf32>
    tpu.vector_store %arg6[%c0_14, %c0_15], %23 {strides = array<i32>} : memref<8x128xf32, #tpu.memory_space<vmem>>, vector<8x128xf32>,
    return
  }
  func.func @transform_0(%arg0: i32) -> (i32, i32) {
    %c0_i32 = arith.constant 0 : i32
    %c0_i32_0 = arith.constant 0 : i32
    return %arg0, %c0_i32 : i32, i32
  }
  func.func @transform_1(%arg0: i32) -> (i32, i32) {
    %c0_i32 = arith.constant 0 : i32
    %c0_i32_0 = arith.constant 0 : i32
    %c0_i32_1 = arith.constant 0 : i32
    return %c0_i32, %c0_i32_0 : i32, i32
  }
  func.func @transform_2(%arg0: i32) -> (i32, i32) {
    %c0_i32 = arith.constant 0 : i32
    %c0_i32_0 = arith.constant 0 : i32
    %c0_i32_1 = arith.constant 0 : i32
    return %c0_i32, %c0_i32_0 : i32, i32
  }
  func.func @transform_3(%arg0: i32) -> (i32, i32) {
    %c0_i32 = arith.constant 0 : i32
    %c0_i32_0 = arith.constant 0 : i32
    %c0_i32_1 = arith.constant 0 : i32
    return %c0_i32, %c0_i32_0 : i32, i32
  }
  func.func @transform_4(%arg0: i32) -> (i32, i32) {
    %c0_i32 = arith.constant 0 : i32
    %c0_i32_0 = arith.constant 0 : i32
    %c0_i32_1 = arith.constant 0 : i32
    return %c0_i32, %c0_i32_0 : i32, i32
  }
  func.func @transform_5(%arg0: i32) -> (i32, i32) {
    %c0_i32 = arith.constant 0 : i32
    %c0_i32_0 = arith.constant 0 : i32
    return %arg0, %c0_i32 : i32, i32
  }
}

</mosaic_0001>

<bundles_post_ra>
// kernel: mlp_forward.1
= control target key start
LH: loop header
LB: loop body
LE: loop exit
PB: predicated region body
PF: predicated region fallthrough
CT: control target
= control target key end

     0   :  { %10 = vsyncpa [#allocation3], 0  ;;  %s1383_s0 = inlined_call_operand.hbm [shape: f32[16,128], index: 0, kind: input, shape index: {}]   ;;  %s1384_s1 = inlined_call_operand.hbm [shape: f32[128,512], index: 1, kind: input, shape index: {}]   ;;  %s1385_s2 = inlined_call_operand.vmem [shape: f32[1,512], index: 2, kind: input, shape index: {}]   ;;  %s1386_s3 = inlined_call_operand.hbm [shape: f32[512,128], index: 3, kind: input, shape index: {}]   ;;  %s1387_s4 = inlined_call_operand.vmem [shape: f32[1,128], index: 4, kind: input, shape index: {}]   ;;  %s1388_s5 = inlined_call_operand.hbm [shape: f32[16,128], index: 5, kind: output, shape index: {}]  }
   0x1   :  { %12 = vsyncpa [#allocation3 + $0x1], 0 }
   0x2   :  { %13 = vsyncpa [#allocation6], 0 }
   0x3   :  { %14 = vsyncpa [#allocation4], 0 }
   0x4   :  { %16 = vsyncpa [#allocation4 + $0x1], 0  ;;  %s1205_s18 = smov 0   ;;  %s1207_s19 = smov 0  }
   0x5   :  { %s1209_s20 = smov 0   ;;  %s1211_s21 = smov 0  }
   0x6 LB: > { %s1226_s22 = sadd.s32 4294967295, %s1164_s21   ;;  %s849_s23 = sadd.s32 4294967294, %s1164_s21   ;;  %s1164_s21 = sphi %s1211_s21, %s1410_s21   ;;  %s1160_s20 = sphi %s1209_s20, %s1409_s20   ;;  %s1156_s19 = sphi %s1207_s19, %s1408_s19   ;;  %s1152_s18 = sphi %s1205_s18, %s1407_s18  }
   0x7   : > { %p42_p0 = scmp.ne.s32.totalorder %s1156_s19, %s1152_s18  ;;  %p1389_p1 = scmp.eq.s32.totalorder %s1226_s22, 0 }
   0x8   : > { %p156_p3 = scmp.eq.s32.totalorder %s849_s23, 1  ;;  %p850_p5 = scmp.ge.s32.totalorder %s1164_s21, 1 }
   0x9   : > { %p1235_p4 = por %p1389_p1, %p42_p0  ;;  %p163_p7 = scmp.lt.s32.totalorder %s1164_s21, 3 }
   0xa   : > { %p1240_p6 = por %p156_p3, %p42_p0  ;;  %s1166_s27 = smov [#allocation5]  }
   0xb   : > { %s1393_s24 = scalar_select %p1235_p4, 1, 0 }
   0xc   : > { %s1394_s25 = scalar_select %p1240_p6, 1, 0 }
   0xd   : > { %p1245_p8 = pnand %p850_p5, %p163_p7  ;;  %s175_s28 = sshll.u32 %s1166_s27, 4  ;;  %s176_s28 = int_to_ptr.vmem [resolvable:$true] %s175_s28 }
   0xe   : > { %s1167_s30 = smov [#allocation7]   ;;  %s1027_s7 = scalar_lea.vmem %s176_s28, 8192 }
   0xf   : > { %s1395_s26 = scalar_select %p1245_p8, 1, 0 }
  0x10   : > { %p948_p9 = pneg %p1245_p8  ;;  %s191_s6 = sshll.u32 %s1167_s30, 4  ;;  %s192_s6 = int_to_ptr.vmem [resolvable:$true] %s191_s6 }
  0x11   : > { %p1028_p13 = scmp.ne.s32.totalorder %s176_s28, %s1027_s7  ;;  %p1035_p5 = scmp.lt.s32.totalorder %s176_s28, %s176_s28 }
  0x12   : > { %p1254_p11 = pnand %p948_p9, %p1389_p1  ;;  %p1036_p7 = scmp.lt.s32.totalorder %s1027_s7, %s1027_s7 }
  0x14   : > { %p1018_p12 = pneg %p1254_p11  ;;  %p1037_p10 = por %p1036_p7, %p1035_p5 }
  0x16   : > { %p1030_p0 = pnand %p1028_p13, %p1018_p12 }
  0x18   : > { %p1031_p3 = pneg %p1030_p0 }
  0x1a   : > { %p1038_p9 = pnand %p1037_p10, %p1031_p3 }
  0x1c   : > { %1041 = shalt.err (!%p1038_p9)
}
  0x1d   : > { %s1168_s8 = smov 512   ;;  %s1169_s9 = smov 32  }
  0x1e   : > { %951 = dma.hbm_to_vmem [thread:$0]  (!%p1254_p11), %s1384_s1, 8192, %s176_s28, [#allocation6], %s1168_s8, %s1168_s8, %s1169_s9  }
  0x1f   : > { %s1053_s12 = scalar_lea.vmem %s192_s6, 8192  ;;  %p1061_p2 = scmp.lt.s32.totalorder %s192_s6, %s192_s6 }
  0x20   : > { %p1054_p1 = scmp.ne.s32.totalorder %s192_s6, %s1053_s12  ;;  %p1062_p6 = scmp.lt.s32.totalorder %s1053_s12, %s1053_s12 }
  0x22   : > { %p1056_p13 = pnand %p1054_p1, %p1018_p12  ;;  %p1063_p5 = por %p1062_p6, %p1061_p2 }
  0x24   : > { %p1057_p0 = pneg %p1056_p13 }
  0x26   : > { %p1064_p10 = pnand %p1063_p5, %p1057_p0 }
  0x28   : > { %1067 = shalt.err (!%p1064_p10)
}
  0x29   : > { %s1170_s13 = smov 128   ;;  %s1171_s14 = smov 8  }
  0x2a   : > { %954 = dma.hbm_to_vmem [thread:$0]  (!%p1254_p11), %s1386_s3, 8192, %s192_s6, [#allocation6], %s1170_s13, %s1170_s13, %s1171_s14  }
  0x2b   : > { %s1277_s17 = sadd.s32 1, %s1164_s21   ;;  %s29_s27 = sadd.s32 1, %s1160_s20 }
  0x2c   : > { %s26_s23 = ssub.s32 %s1164_s21, %s1277_s17  ;;  %p36_p2 = scmp.ne.s32.totalorder %s1160_s20, %s1156_s19 }
  0x2d   : > { %p27_p1 = scmp.eq.s32.totalorder %s26_s23, 0  ;;  %p37_p6 = scmp.eq.s32.totalorder %s1164_s21, 0 }
  0x2e   : > { %p1397_p3 = scmp.eq.s32.totalorder %s1226_s22, 1  ;;  %p965_p9 = scmp.lt.s32.totalorder %s1164_s21, 2 }
  0x2f   : > { %s1286_s28 = scalar_select %p27_p1, %s1160_s20, %s29_s27  }
  0x30   : > { %p38_p12 = por %p37_p6, %p36_p2  ;;  %p1290_p7 = por %p1397_p3, %p36_p2 }
  0x31   : > { %s208_s29 = sand.u32 1, %s1160_s20   ;;  %s855_s6 = sshll.u32 %s1164_s21, 7 }
  0x32   : > { %s1398_s30 = scalar_select %p1290_p7, 1, 0 }
  0x33   : > { %s854_s7 = sshll.u32 %s208_s29, 3  ;;  %s1300_s10 = scalar_lea.hbm %s1383_s0, %s855_s6 }
  0x34   : > { %s212_s11 = scalar_lea.vmem [#allocation2], %s854_s7  ;;  %p1302_p11 = pnand %p965_p9, %p38_p12 }
  0x35   : > { %s219_s12 = sshll.u32 %s212_s11, 4  ;;  %s209_s14 = scalar_lea.sflag [#allocation3], %s208_s29  ;;  %s220_s12 = int_to_ptr.vmem [resolvable:$true] %s219_s12 }
  0x36   : > { %s1068_s15 = scalar_lea.hbm %s1300_s10, 128  ;;  %p1070_p0 = pneg %p1302_p11 }
  0x37   : > { %p1069_p13 = scmp.ne.s32.totalorder %s1300_s10, %s1068_s15  ;;  %s1073_s27 = scalar_lea.hbm %s1383_s0, 256 }
  0x38   : > { %p1074_p1 = scmp.lt.s32.totalorder %s1300_s10, %s1383_s0  ;;  %p1075_p2 = scmp.lt.s32.totalorder %s1073_s27, %s1068_s15 }
  0x39   : > { %p1071_p5 = pnand %p1070_p0, %p1069_p13 }
  0x3a   : > { %p1076_p6 = por %p1075_p2, %p1074_p1 }
  0x3b   : > { %p1072_p10 = pneg %p1071_p5 }
  0x3d   : > { %p1077_p12 = pnand %p1076_p6, %p1072_p10 }
  0x3f   : > { %1080 = shalt.err (!%p1077_p12)
}
  0x40   : > { %s1081_s8 = scalar_lea.vmem %s220_s12, 128  ;;  %s1172_s29 = smov [#allocation2]  }
  0x41   : > { %p1082_p3 = scmp.ne.s32.totalorder %s220_s12, %s1081_s8  ;;  %s1086_s9 = sshll.u32 %s1172_s29, 4  ;;  %s1087_s9 = int_to_ptr.vmem [resolvable:$false] %s1086_s9 }
  0x42   : > { %s1088_s11 = scalar_lea.vmem %s1087_s9, 256  ;;  %p1089_p13 = scmp.lt.s32.totalorder %s220_s12, %s1087_s9 }
  0x43   : > { %p1084_p9 = pnand %p1082_p3, %p1070_p0  ;;  %p1090_p5 = scmp.lt.s32.totalorder %s1088_s11, %s1081_s8 }
  0x45   : > { %p1085_p7 = pneg %p1084_p9  ;;  %p1091_p4 = por %p1090_p5, %p1089_p13 }
  0x47   : > { %p1092_p8 = pnand %p1091_p4, %p1085_p7 }
  0x49   : > { %1095 = shalt.err (!%p1092_p8)
}
  0x4a   : > { %958 = dma.hbm_to_vmem [thread:$0]  (!%p1302_p11), %s1300_s10, 128, %s220_s12, %s209_s14  }
  0x4b   : > { %p1400_p10 = scmp.ne.s32.totalorder %s1395_s26, 0 }
  0x4c   : > { %s1323_s15 = sand.u32 (!%p1400_p10), 1, %s1156_s19   ;;  %p1401_p4 = scmp.ne.s32.totalorder (!%p1400_p10), %s1393_s24, 0 }
  0x4d   : > { %228 = sbr.rel (%p1400_p10) target bundleno = 560 (0x230), region = 40  ;;  %s857_s16 = sshll.u32 (!%p1400_p10), %s1323_s15, 3 }
  0x4e   : > { %s231_s23 = scalar_lea.sflag (!%p1400_p10), [#allocation3], %s1323_s15  ;;  %s1329_s27 = scalar_lea.vmem (!%p1400_p10), [#allocation2], %s857_s16 }
  0x52   : > { %1139 = dma.done.wait (%p1401_p4), %s231_s23, 128  }
  0x53   : > { %1141 = vsyncadd (%p1401_p4), %s231_s23, 4294967168  ;;  %p1402_p8 = scmp.eq.s32.totalorder %s1226_s22, 0 }
  0x55   : > { %1143 = dma.done.wait (%p1402_p8), [#allocation6], 16384   ;;  %p1403_p7 = pmov %p1402_p8 }
  0x56   : > { %v1173_v0 = vmov 0.0   ;;  %v331_v1 = vld [vmem:[#allocation5 + $0x1e8] sm:$0xff]  ;;  %v333_v2 = vld [vmem:[#allocation5 + $0x1f8] sm:$0xff]  ;;  %v330_v3 = vld [vmem:[#allocation5 + $0x1e0] sm:$0xff]  ;;  %s863_s13 = sshll.u32 %s1226_s22, 7  ;;  %s268_s14 = scalar_lea.vmem [#allocation8], %s857_s16 }
  0x57   : > { %1145 = vsyncadd (%p1403_p7), [#allocation6], 4294950912  ;;  %420 = vmatprep.mubr.f32.mxu0 %v1173_v0  ;;  %491 = vmatprep.mubr.f32.mxu1 %v1173_v0  ;;  %v332_v4 = vld [vmem:[#allocation5 + $0x1f0] sm:$0xff]  ;;  %v327_v5 = vld [vmem:[#allocation5 + $0x1c8] sm:$0xff]  ;;  %s760_s6 = sshll.u32 %s268_s14, 4  ;;  %s758_s29 = scalar_lea.hbm %s1388_s5, %s863_s13  ;;  %s761_s6 = int_to_ptr.vmem [resolvable:$true] %s760_s6 }
  0x58   : > { %356 = vmatprep.subr.mxu0 %v331_v1  ;;  %427 = vmatprep.subr.mxu1 %v333_v2  ;;  %v329_v6 = vld [vmem:[#allocation5 + $0x1d8] sm:$0xff]  ;;  %v326_v7 = vld [vmem:[#allocation5 + $0x1c0] sm:$0xff]  ;;  %v328_v8 = vld [vmem:[#allocation5 + $0x1d0] sm:$0xff]  ;;  %s747_s9 = scalar_lea.sflag [#allocation4], %s1323_s15  ;;  %s1096_s11 = scalar_lea.vmem %s761_s6, 128 }
  0x59   : > { %357 = vmatpush1.msra.mxu0 %v330_v3  ;;  %428 = vmatpush1.msra.mxu1 %v332_v4  ;;  %v323_v9 = vld [vmem:[#allocation5 + $0x1a8] sm:$0xff]  ;;  %v325_v10 = vld [vmem:[#allocation5 + $0x1b8] sm:$0xff]  ;;  %v322_v11 = vld [vmem:[#allocation5 + $0x1a0] sm:$0xff]  ;;  %p1097_p11 = scmp.ne.s32.totalorder %s761_s6, %s1096_s11  ;;  %p1404_p0 = scmp.ne.s32.totalorder %s1398_s30, 0 }
  0x5a   : > { %358 = vmatprep.subr.mxu0 %v327_v5  ;;  %429 = vmatprep.subr.mxu1 %v329_v6  ;;  %v324_v12 = vld [vmem:[#allocation5 + $0x1b0] sm:$0xff]  ;;  %v319_v13 = vld [vmem:[#allocation5 + $0x188] sm:$0xff]  ;;  %v321_v14 = vld [vmem:[#allocation5 + $0x198] sm:$0xff]  ;;  %s1174_s23 = smov [#allocation8]  }
  0x5b   : > { %359 = vmatpush1.msra.mxu0 %v326_v7  ;;  %430 = vmatpush1.msra.mxu1 %v328_v8  ;;  %v318_v15 = vld [vmem:[#allocation5 + $0x180] sm:$0xff]  ;;  %v320_v16 = vld [vmem:[#allocation5 + $0x190] sm:$0xff]  ;;  %v315_v17 = vld [vmem:[#allocation5 + $0x168] sm:$0xff]  ;;  %p1098_p1 = pnand %p1097_p11, %p1404_p0  ;;  %s1100_s22 = sshll.u32 %s1174_s23, 4  ;;  %s1101_s22 = int_to_ptr.vmem [resolvable:$false] %s1100_s22 }
  0x5c   : > { %360 = vmatprep.subr.mxu0 %v323_v9  ;;  %431 = vmatprep.subr.mxu1 %v325_v10  ;;  %v317_v18 = vld [vmem:[#allocation5 + $0x178] sm:$0xff]  ;;  %v314_v19 = vld [vmem:[#allocation5 + $0x160] sm:$0xff]  ;;  %v316_v20 = vld [vmem:[#allocation5 + $0x170] sm:$0xff]  ;;  %s1102_s16 = scalar_lea.vmem %s1101_s22, 256  ;;  %p1103_p6 = scmp.lt.s32.totalorder %s761_s6, %s1101_s22 }
  0x5d   : > { %361 = vmatpush1.msra.mxu0 %v322_v11  ;;  %432 = vmatpush1.msra.mxu1 %v324_v12  ;;  %v311_v21 = vld [vmem:[#allocation5 + $0x148] sm:$0xff]  ;;  %v313_v22 = vld [vmem:[#allocation5 + $0x158] sm:$0xff]  ;;  %v310_v23 = vld [vmem:[#allocation5 + $0x140] sm:$0xff]  ;;  %p1099_p2 = pneg %p1098_p1  ;;  %p1104_p12 = scmp.lt.s32.totalorder %s1102_s16, %s1096_s11 }
  0x5e   : > { %362 = vmatprep.subr.mxu0 %v319_v13  ;;  %433 = vmatprep.subr.mxu1 %v321_v14  ;;  %v312_v24 = vld [vmem:[#allocation5 + $0x150] sm:$0xff]  ;;  %v307_v25 = vld [vmem:[#allocation5 + $0x128] sm:$0xff]  ;;  %v309_v26 = vld [vmem:[#allocation5 + $0x138] sm:$0xff] }
  0x5f   : > { %363 = vmatpush1.msra.mxu0 %v318_v15  ;;  %434 = vmatpush1.msra.mxu1 %v320_v16  ;;  %v306_v27 = vld [vmem:[#allocation5 + $0x120] sm:$0xff]  ;;  %v308_v28 = vld [vmem:[#allocation5 + $0x130] sm:$0xff]  ;;  %v303_v29 = vld [vmem:[#allocation5 + $0x108] sm:$0xff]  ;;  %p1105_p3 = por %p1104_p12, %p1103_p6 }
  0x60   : > { %364 = vmatprep.subr.mxu0 %v315_v17  ;;  %435 = vmatprep.subr.mxu1 %v317_v18  ;;  %v305_v30 = vld [vmem:[#allocation5 + $0x118] sm:$0xff]  ;;  %v302_v31 = vld [vmem:[#allocation5 + $0x100] sm:$0xff]  ;;  %v304_v32 = vld [vmem:[#allocation5 + $0x110] sm:$0xff] }
  0x61   : > { %365 = vmatpush1.msra.mxu0 %v314_v19  ;;  %436 = vmatpush1.msra.mxu1 %v316_v20  ;;  %v299_v33 = vld [vmem:[#allocation5 + $0xe8] sm:$0xff]  ;;  %v301_v34 = vld [vmem:[#allocation5 + $0xf8] sm:$0xff]  ;;  %v298_v35 = vld [vmem:[#allocation5 + $0xe0] sm:$0xff]  ;;  %p1106_p9 = pnand %p1105_p3, %p1099_p2 }
  0x62   : > { %366 = vmatprep.subr.mxu0 %v311_v21  ;;  %437 = vmatprep.subr.mxu1 %v313_v22  ;;  %v300_v36 = vld [vmem:[#allocation5 + $0xf0] sm:$0xff]  ;;  %v295_v37 = vld [vmem:[#allocation5 + $0xc8] sm:$0xff]  ;;  %v297_v38 = vld [vmem:[#allocation5 + $0xd8] sm:$0xff] }
  0x63   : > { %367 = vmatpush1.msra.mxu0 %v310_v23  ;;  %438 = vmatpush1.msra.mxu1 %v312_v24  ;;  %v294_v39 = vld [vmem:[#allocation5 + $0xc0] sm:$0xff]  ;;  %v296_v40 = vld [vmem:[#allocation5 + $0xd0] sm:$0xff]  ;;  %v291_v41 = vld [vmem:[#allocation5 + $0xa8] sm:$0xff] }
  0x64   : > { %368 = vmatprep.subr.mxu0 %v307_v25  ;;  %439 = vmatprep.subr.mxu1 %v309_v26  ;;  %v293_v42 = vld [vmem:[#allocation5 + $0xb8] sm:$0xff]  ;;  %v290_v43 = vld [vmem:[#allocation5 + $0xa0] sm:$0xff]  ;;  %v292_v44 = vld [vmem:[#allocation5 + $0xb0] sm:$0xff] }
  0x65   : > { %369 = vmatpush1.msra.mxu0 %v306_v27  ;;  %440 = vmatpush1.msra.mxu1 %v308_v28  ;;  %v287_v45 = vld [vmem:[#allocation5 + $0x88] sm:$0xff]  ;;  %v289_v46 = vld [vmem:[#allocation5 + $0x98] sm:$0xff]  ;;  %v286_v47 = vld [vmem:[#allocation5 + $0x80] sm:$0xff] }
  0x66   : > { %370 = vmatprep.subr.mxu0 %v303_v29  ;;  %441 = vmatprep.subr.mxu1 %v305_v30  ;;  %v288_v48 = vld [vmem:[#allocation5 + $0x90] sm:$0xff]  ;;  %v283_v49 = vld [vmem:[#allocation5 + $0x68] sm:$0xff]  ;;  %v285_v50 = vld [vmem:[#allocation5 + $0x78] sm:$0xff] }
  0x67   : > { %371 = vmatpush1.msra.mxu0 %v302_v31  ;;  %442 = vmatpush1.msra.mxu1 %v304_v32  ;;  %v282_v51 = vld [vmem:[#allocation5 + $0x60] sm:$0xff]  ;;  %v284_v52 = vld [vmem:[#allocation5 + $0x70] sm:$0xff]  ;;  %v279_v53 = vld [vmem:[#allocation5 + $0x48] sm:$0xff] }
  0x68   : > { %372 = vmatprep.subr.mxu0 %v299_v33  ;;  %443 = vmatprep.subr.mxu1 %v301_v34  ;;  %v281_v54 = vld [vmem:[#allocation5 + $0x58] sm:$0xff]  ;;  %v278_v55 = vld [vmem:[#allocation5 + $0x40] sm:$0xff]  ;;  %v280_v56 = vld [vmem:[#allocation5 + $0x50] sm:$0xff] }
  0x69   : > { %373 = vmatpush1.msra.mxu0 %v298_v35  ;;  %444 = vmatpush1.msra.mxu1 %v300_v36  ;;  %v275_v57 = vld [vmem:[#allocation5 + $0x28] sm:$0xff]  ;;  %v277_v58 = vld [vmem:[#allocation5 + $0x38] sm:$0xff]  ;;  %v274_v59 = vld [vmem:[#allocation5 + $0x20] sm:$0xff] }
  0x6a   : > { %374 = vmatprep.subr.mxu0 %v295_v37  ;;  %445 = vmatprep.subr.mxu1 %v297_v38  ;;  %v276_v60 = vld [vmem:[#allocation5 + $0x30] sm:$0xff]  ;;  %v271_v61 = vld [vmem:[#allocation5 + $0x8] sm:$0xff]  ;;  %v273_v62 = vld [vmem:[#allocation5 + $0x18] sm:$0xff] }
  0x6b   : > { %375 = vmatpush1.msra.mxu0 %v294_v39  ;;  %446 = vmatpush1.msra.mxu1 %v296_v40  ;;  %v270_v63 = vld [vmem:[#allocation5] sm:$0xff]  ;;  %v272_v0 = vld [vmem:[#allocation5 + $0x10] sm:$0xff]  ;;  %v565_v2 = vld [vmem:[#allocation7 + $0xf8] sm:$0xff] }
  0x6c   : > { %376 = vmatprep.subr.mxu0 %v291_v41  ;;  %447 = vmatprep.subr.mxu1 %v293_v42  ;;  %v269_v1 = vld [vmem:[%s1329_s27] sm:$0xff]  ;;  %v563_v10 = vld [vmem:[#allocation7 + $0xe8] sm:$0xff]  ;;  %v562_v14 = vld [vmem:[#allocation7 + $0xe0] sm:$0xff] }
  0x6d   : > { %377 = vmatpush1.msra.mxu0 %v290_v43  ;;  %448 = vmatpush1.msra.mxu1 %v292_v44  ;;  %v597_v3 = vld [vmem:[#allocation7 + $0x1f8] sm:$0xff]  ;;  %v564_v6 = vld [vmem:[#allocation7 + $0xf0] sm:$0xff]  ;;  %v595_v11 = vld [vmem:[#allocation7 + $0x1e8] sm:$0xff] }
  0x6e   : > { %378 = vmatprep.subr.mxu0 %v287_v45  ;;  %449 = vmatprep.subr.mxu1 %v289_v46  ;;  %v549_v4 = vld [vmem:[#allocation7 + $0x78] sm:$0xff]  ;;  %v596_v7 = vld [vmem:[#allocation7 + $0x1f0] sm:$0xff]  ;;  %v547_v12 = vld [vmem:[#allocation7 + $0x68] sm:$0xff] }
  0x6f   : > { %379 = vmatpush1.msra.mxu0 %v286_v47  ;;  %450 = vmatpush1.msra.mxu1 %v288_v48  ;;  %v581_v5 = vld [vmem:[#allocation7 + $0x178] sm:$0xff]  ;;  %v548_v8 = vld [vmem:[#allocation7 + $0x70] sm:$0xff]  ;;  %v579_v13 = vld [vmem:[#allocation7 + $0x168] sm:$0xff] }
  0x70   : > { %380 = vmatprep.subr.mxu0 %v283_v49  ;;  %451 = vmatprep.subr.mxu1 %v285_v50  ;;  %v580_v9 = vld [vmem:[#allocation7 + $0x170] sm:$0xff]  ;;  %v594_v15 = vld [vmem:[#allocation7 + $0x1e0] sm:$0xff]  ;;  %v561_v18 = vld [vmem:[#allocation7 + $0xd8] sm:$0xff] }
  0x71   : > { %381 = vmatpush1.msra.mxu0 %v282_v51  ;;  %452 = vmatpush1.msra.mxu1 %v284_v52  ;;  %v546_v16 = vld [vmem:[#allocation7 + $0x60] sm:$0xff]  ;;  %v593_v19 = vld [vmem:[#allocation7 + $0x1d8] sm:$0xff]  ;;  %v560_v22 = vld [vmem:[#allocation7 + $0xd0] sm:$0xff] }
  0x72   : > { %382 = vmatprep.subr.mxu0 %v279_v53  ;;  %453 = vmatprep.subr.mxu1 %v281_v54  ;;  %v578_v17 = vld [vmem:[#allocation7 + $0x160] sm:$0xff]  ;;  %v545_v20 = vld [vmem:[#allocation7 + $0x58] sm:$0xff]  ;;  %v592_v23 = vld [vmem:[#allocation7 + $0x1d0] sm:$0xff] }
  0x73   : > { %383 = vmatpush1.msra.mxu0 %v278_v55  ;;  %454 = vmatpush1.msra.mxu1 %v280_v56  ;;  %v577_v21 = vld [vmem:[#allocation7 + $0x158] sm:$0xff]  ;;  %v544_v24 = vld [vmem:[#allocation7 + $0x50] sm:$0xff]  ;;  %v559_v26 = vld [vmem:[#allocation7 + $0xc8] sm:$0xff] }
  0x74   : > { %384 = vmatprep.subr.mxu0 %v275_v57  ;;  %455 = vmatprep.subr.mxu1 %v277_v58  ;;  %v576_v25 = vld [vmem:[#allocation7 + $0x150] sm:$0xff]  ;;  %v591_v27 = vld [vmem:[#allocation7 + $0x1c8] sm:$0xff]  ;;  %v558_v30 = vld [vmem:[#allocation7 + $0xc0] sm:$0xff] }
  0x75   : > { %385 = vmatpush1.msra.mxu0 %v274_v59  ;;  %456 = vmatpush1.msra.mxu1 %v276_v60  ;;  %v543_v28 = vld [vmem:[#allocation7 + $0x48] sm:$0xff]  ;;  %v590_v31 = vld [vmem:[#allocation7 + $0x1c0] sm:$0xff]  ;;  %v557_v34 = vld [vmem:[#allocation7 + $0xb8] sm:$0xff] }
  0x76   : > { %386 = vmatprep.subr.mxu0 %v271_v61  ;;  %457 = vmatprep.subr.mxu1 %v273_v62  ;;  %v575_v29 = vld [vmem:[#allocation7 + $0x148] sm:$0xff]  ;;  %v542_v32 = vld [vmem:[#allocation7 + $0x40] sm:$0xff]  ;;  %v589_v35 = vld [vmem:[#allocation7 + $0x1b8] sm:$0xff] }
  0x77   : > { %387 = vmatpush1.msra.mxu0 %v270_v63  ;;  %458 = vmatpush1.msra.mxu1 %v272_v0  ;;  %v574_v33 = vld [vmem:[#allocation7 + $0x140] sm:$0xff]  ;;  %v541_v36 = vld [vmem:[#allocation7 + $0x38] sm:$0xff]  ;;  %v556_v38 = vld [vmem:[#allocation7 + $0xb0] sm:$0xff] }
  0x78   : > { %421 = vmatmul.mubr.f32.vlgmr.msra.gmra.mxu0 %v269_v1  ;;  %492 = vmatmul.mubr.f32.vlgmr.msra.gmra.mxu1 %v269_v1  ;;  %v573_v37 = vld [vmem:[#allocation7 + $0x138] sm:$0xff]  ;;  %v588_v39 = vld [vmem:[#allocation7 + $0x1b0] sm:$0xff]  ;;  %v555_v42 = vld [vmem:[#allocation7 + $0xa8] sm:$0xff] }
  0x79   : > { %866 = vmatprep.subr.mxu0 %v565_v2  ;;  %901 = vmatprep.subr.mxu1 %v597_v3  ;;  %v540_v40 = vld [vmem:[#allocation7 + $0x30] sm:$0xff]  ;;  %v587_v43 = vld [vmem:[#allocation7 + $0x1a8] sm:$0xff]  ;;  %v554_v46 = vld [vmem:[#allocation7 + $0xa0] sm:$0xff]  ;;  %v336_v2 = vlaneseq }
  0x7a   : > { %867 = vmatpush3.msra.mxu0 %v549_v4  ;;  %902 = vmatpush3.msra.mxu1 %v581_v5  ;;  %v572_v41 = vld [vmem:[#allocation7 + $0x130] sm:$0xff]  ;;  %v539_v44 = vld [vmem:[#allocation7 + $0x28] sm:$0xff]  ;;  %v586_v47 = vld [vmem:[#allocation7 + $0x1a0] sm:$0xff] }
  0x7b   : > { %868 = vmatprep.subr.mxu0 %v564_v6  ;;  %903 = vmatprep.subr.mxu1 %v596_v7  ;;  %v571_v45 = vld [vmem:[#allocation7 + $0x128] sm:$0xff]  ;;  %v538_v48 = vld [vmem:[#allocation7 + $0x20] sm:$0xff]  ;;  %v553_v50 = vld [vmem:[#allocation7 + $0x98] sm:$0xff]  ;;  %v337_v3 = vshrl.u32 %v336_v2, 7 }
  0x7c   : > { %869 = vmatpush3.msra.mxu0 %v548_v8  ;;  %904 = vmatpush3.msra.mxu1 %v580_v9  ;;  %v570_v49 = vld [vmem:[#allocation7 + $0x120] sm:$0xff]  ;;  %v585_v51 = vld [vmem:[#allocation7 + $0x198] sm:$0xff]  ;;  %v552_v54 = vld [vmem:[#allocation7 + $0x90] sm:$0xff] }
  0x7d   : > { %870 = vmatprep.subr.mxu0 %v563_v10  ;;  %905 = vmatprep.subr.mxu1 %v595_v11  ;;  %v537_v52 = vld [vmem:[#allocation7 + $0x18] sm:$0xff]  ;;  %v584_v55 = vld [vmem:[#allocation7 + $0x190] sm:$0xff]  ;;  %v551_v58 = vld [vmem:[#allocation7 + $0x88] sm:$0xff]  ;;  %v338_v4 = vsub.s32 0, %v337_v3  ;;  %v346_v5 = vsub.s32 2, %v337_v3  ;;  %v342_v7 = vsub.s32 1, %v337_v3 }
  0x7e   : > { %871 = vmatpush3.msra.mxu0 %v547_v12  ;;  %906 = vmatpush3.msra.mxu1 %v579_v13  ;;  %v569_v53 = vld [vmem:[#allocation7 + $0x118] sm:$0xff]  ;;  %v536_v56 = vld [vmem:[#allocation7 + $0x10] sm:$0xff]  ;;  %v583_v59 = vld [vmem:[#allocation7 + $0x188] sm:$0xff]  ;;  %v350_v8 = vsub.s32 3, %v337_v3 }
  0x7f   : > { %872 = vmatprep.subr.mxu0 %v562_v14  ;;  %907 = vmatprep.subr.mxu1 %v594_v15  ;;  %v568_v57 = vld [vmem:[#allocation7 + $0x110] sm:$0xff]  ;;  %v535_v60 = vld [vmem:[#allocation7 + $0x8] sm:$0xff]  ;;  %v550_v62 = vld [vmem:[#allocation7 + $0x80] sm:$0xff] }
  0x80   : > { %873 = vmatpush3.msra.mxu0 %v546_v16  ;;  %908 = vmatpush3.msra.mxu1 %v578_v17  ;;  %v567_v61 = vld [vmem:[#allocation7 + $0x108] sm:$0xff]  ;;  %v582_v63 = vld [vmem:[#allocation7 + $0x180] sm:$0xff]  ;;  %v334_v6 = vld [vmem:[%s1385_s2] sm:$0xf] }
  0x81   : > { %874 = vmatprep.subr.mxu0 %v561_v18  ;;  %909 = vmatprep.subr.mxu1 %v593_v19  ;;  %v534_v0 = vld [vmem:[#allocation7] sm:$0xff]  ;;  %v339_v9 = vrot.slane %v334_v6, %v338_v4  ;;  %v347_v10 = vrot.slane %v334_v6, %v346_v5  ;;  %v343_v11 = vrot.slane %v334_v6, %v342_v7 }
  0x82   : > { %875 = vmatpush3.msra.mxu0 %v545_v20  ;;  %910 = vmatpush3.msra.mxu1 %v577_v21  ;;  %v566_v1 = vld [vmem:[#allocation7 + $0x100] sm:$0xff]  ;;  %v351_v12 = vrot.slane %v334_v6, %v350_v8 }
  0x83   : > { %876 = vmatprep.subr.mxu0 %v560_v22  ;;  %911 = vmatprep.subr.mxu1 %v592_v23 }
  0x84   : > { %877 = vmatpush3.msra.mxu0 %v544_v24  ;;  %912 = vmatpush3.msra.mxu1 %v576_v25 }
  0x85   : > { %878 = vmatprep.subr.mxu0 %v559_v26  ;;  %913 = vmatprep.subr.mxu1 %v591_v27 }
  0x86   : > { %879 = vmatpush3.msra.mxu0 %v543_v28  ;;  %914 = vmatpush3.msra.mxu1 %v575_v29 }
  0x87   : > { %880 = vmatprep.subr.mxu0 %v558_v30  ;;  %915 = vmatprep.subr.mxu1 %v590_v31 }
  0x88   : > { %881 = vmatpush3.msra.mxu0 %v542_v32  ;;  %916 = vmatpush3.msra.mxu1 %v574_v33 }
  0x89   : > { %882 = vmatprep.subr.mxu0 %v557_v34  ;;  %917 = vmatprep.subr.mxu1 %v589_v35 }
  0x8a   : > { %883 = vmatpush3.msra.mxu0 %v541_v36  ;;  %918 = vmatpush3.msra.mxu1 %v573_v37 }
  0x8b   : > { %884 = vmatprep.subr.mxu0 %v556_v38  ;;  %919 = vmatprep.subr.mxu1 %v588_v39 }
  0x8c   : > { %885 = vmatpush3.msra.mxu0 %v540_v40  ;;  %920 = vmatpush3.msra.mxu1 %v572_v41 }
  0x8d   : > { %886 = vmatprep.subr.mxu0 %v555_v42  ;;  %921 = vmatprep.subr.mxu1 %v587_v43 }
  0x8e   : > { %887 = vmatpush3.msra.mxu0 %v539_v44  ;;  %922 = vmatpush3.msra.mxu1 %v571_v45 }
  0x8f   : > { %888 = vmatprep.subr.mxu0 %v554_v46  ;;  %923 = vmatprep.subr.mxu1 %v586_v47 }
  0x90   : > { %889 = vmatpush3.msra.mxu0 %v538_v48  ;;  %924 = vmatpush3.msra.mxu1 %v570_v49 }
  0x91   : > { %890 = vmatprep.subr.mxu0 %v553_v50  ;;  %925 = vmatprep.subr.mxu1 %v585_v51 }
  0x92   : > { %891 = vmatpush3.msra.mxu0 %v537_v52  ;;  %926 = vmatpush3.msra.mxu1 %v569_v53 }
  0x93   : > { %892 = vmatprep.subr.mxu0 %v552_v54  ;;  %927 = vmatprep.subr.mxu1 %v584_v55 }
  0x94   : > { %893 = vmatpush3.msra.mxu0 %v536_v56  ;;  %928 = vmatpush3.msra.mxu1 %v568_v57 }
  0x95   : > { %894 = vmatprep.subr.mxu0 %v551_v58  ;;  %929 = vmatprep.subr.mxu1 %v583_v59  ;;  %v861_v59 = vld [vmem:[%s1387_s4] ss:$0 sm:$0xff] }
  0x96   : > { %895 = vmatpush3.msra.mxu0 %v535_v60  ;;  %930 = vmatpush3.msra.mxu1 %v567_v61 }
  0x97   : > { %896 = vmatprep.subr.mxu0 %v550_v62  ;;  %931 = vmatprep.subr.mxu1 %v582_v63 }
  0x98   : > { %897 = vmatpush3.msra.mxu0 %v534_v0  ;;  %932 = vmatpush3.msra.mxu1 %v566_v1 }
 0x138   : > { %v422_v13 = vpop.f32.mrf.mxu0  ;;  %v493_v14 = vpop.f32.mrf.mxu1 }
 0x139   : > { %v423_v15 = vadd.f32 %v422_v13, %v339_v9  ;;  %v494_v16 = vadd.f32 %v493_v14, %v347_v10 }
 0x13a   : > { %v424_v17 = vpop.f32.mrf.mxu0  ;;  %v495_v18 = vpop.f32.mrf.mxu1 }
 0x13b   : > { %v502_v19 = vmul.f32 0.044715, %v423_v15  ;;  %v504_v20 = vmul.f32 0.044715, %v494_v16  ;;  %v425_v21 = vadd.f32 %v424_v17, %v343_v11  ;;  %v496_v22 = vadd.f32 %v495_v18, %v351_v12 }
 0x13c   : > { %v498_v51 = vmul.f32 0.5, %v423_v15  ;;  %v500_v53 = vmul.f32 0.5, %v494_v16 }
 0x13d   : > { %v506_v23 = vmul.f32 %v502_v19, %v423_v15  ;;  %v508_v24 = vmul.f32 %v504_v20, %v494_v16  ;;  %v503_v25 = vmul.f32 0.044715, %v425_v21  ;;  %v505_v26 = vmul.f32 0.044715, %v496_v22 }
 0x13e   : > { %v499_v46 = vmul.f32 0.5, %v425_v21  ;;  %v501_v49 = vmul.f32 0.5, %v496_v22 }
 0x13f   : > { %v510_v27 = vmul.f32 %v506_v23, %v423_v15  ;;  %v512_v28 = vmul.f32 %v508_v24, %v494_v16  ;;  %v507_v29 = vmul.f32 %v503_v25, %v425_v21  ;;  %v509_v30 = vmul.f32 %v505_v26, %v496_v22 }
 0x141   : > { %v514_v31 = vadd.f32 %v510_v27, %v423_v15  ;;  %v516_v32 = vadd.f32 %v512_v28, %v494_v16  ;;  %v511_v33 = vmul.f32 %v507_v29, %v425_v21  ;;  %v513_v34 = vmul.f32 %v509_v30, %v496_v22 }
 0x143   : > { %v515_v35 = vadd.f32 %v511_v33, %v425_v21  ;;  %v517_v36 = vadd.f32 %v513_v34, %v496_v22  ;;  %v518_v37 = vmul.f32 0.7978846, %v514_v31  ;;  %v520_v38 = vmul.f32 0.7978846, %v516_v32 }
 0x145   : > { %v519_v39 = vmul.f32 0.7978846, %v515_v35  ;;  %v521_v40 = vmul.f32 0.7978846, %v517_v36  ;;  %1008 = vtanh.f32 %v518_v37 }
 0x146   : > { %1010 = vtanh.f32 %v520_v38 }
 0x147   : > { %1012 = vtanh.f32 %v519_v39 }
 0x148   : > { %1014 = vtanh.f32 %v521_v40 }
 0x152   : > { %v1009_v41 = vpop.eup %1008 }
 0x153   : > { %v1011_v42 = vpop.eup %1010  ;;  %v526_v44 = vadd.f32 1.0, %v1009_v41 }
 0x154   : > { %v1013_v43 = vpop.eup %1012  ;;  %v528_v48 = vadd.f32 1.0, %v1011_v42 }
 0x155   : > { %v1015_v45 = vpop.eup %1014  ;;  %v527_v47 = vadd.f32 1.0, %v1013_v43  ;;  %v530_v55 = vmul.f32 %v526_v44, %v498_v51 }
 0x156   : > { %v529_v50 = vadd.f32 1.0, %v1015_v45  ;;  %v532_v56 = vmul.f32 %v528_v48, %v500_v53 }
 0x157   : > { %v531_v52 = vmul.f32 %v527_v47, %v499_v46 }
 0x158   : > { %v533_v54 = vmul.f32 %v529_v50, %v501_v49 }
 0x159   : > { %669 = vmatprep.mubr.f32.mxu0 %v531_v52 }
 0x15a   : > { %739 = vmatprep.mubr.f32.mxu1 %v533_v54  ;;  %670 = vmatmul.mubr.f32.vlgmr.msra.gmra.mxu0 %v530_v55 }
 0x15b   : > { %740 = vmatmul.mubr.f32.vlgmr.msra.gmra.mxu1 %v532_v56 }
 0x21a   : > { %v898_v57 = vpop.f32.mrf.mxu0 }
 0x21b   : > { %v933_v58 = vpop.f32.mrf.mxu1 }
 0x21c   : > { %v899_v60 = vpop.f32.mrf.mxu0 }
 0x21d   : > { %v900_v61 = vadd.f32 %v899_v60, %v898_v57  ;;  %v934_v62 = vpop.f32.mrf.mxu1 }
 0x21e   : > { %v935_v0 = vadd.f32 %v934_v62, %v933_v58 }
 0x21f   : > { %v672_v63 = vadd.f32 %v900_v61, %v861_v59 }
 0x221   : > { %v742_v1 = vadd.f32 %v935_v0, %v672_v63 }
 0x223   : > { %745 = vst [vmem:[%s268_s14] sm:$0xff] %v742_v1 }
 0x224   : > { %1109 = shalt.err (!%p1106_p9)
}
 0x225   : > { %s1110_s27 = scalar_lea.hbm %s758_s29, 128  ;;  %s1114_s26 = scalar_lea.hbm %s1388_s5, 256 }
 0x226   : > { %p1111_p13 = scmp.ne.s32.totalorder %s758_s29, %s1110_s27  ;;  %p1115_p4 = scmp.lt.s32.totalorder %s758_s29, %s1388_s5 }
 0x227   : > { %p1116_p8 = scmp.lt.s32.totalorder %s1114_s26, %s1110_s27 }
 0x228   : > { %p1112_p5 = pnand %p1111_p13, %p1404_p0 }
 0x229   : > { %p1117_p7 = por %p1116_p8, %p1115_p4 }
 0x22a   : > { %p1113_p10 = pneg %p1112_p5 }
 0x22c   : > { %p1118_p11 = pnand %p1117_p7, %p1113_p10 }
 0x22e   : > { %1121 = shalt.err (!%p1118_p11)
}
 0x22f   : > { %946 = dma.vmem_to_hbm [thread:$0]  (%p1404_p0), %s761_s6, 128, %s758_s29, %s747_s9  }
 0x230 PF: > { %s772_s13 = sand.u32 1, %s1152_s18   ;;  %p1405_p1 = scmp.ne.s32.totalorder %s1394_s25, 0 }
 0x231   : > { %p1406_p2 = scmp.ge.s32.totalorder %s1164_s21, 2  ;;  %s773_s14 = scalar_lea.sflag [#allocation4], %s772_s13 }
 0x233   : > { %p960_p6 = pnand %p1406_p2, %p1405_p1 }
 0x235   : > { %p961_p12 = pneg %p960_p6 }
 0x237   : > { %1147 = dma.done.wait (%p961_p12), %s773_s14, 128  }
 0x238   : > { %1149 = vsyncadd (%p961_p12), %s773_s14, 4294967168  ;;  %p19_p3 = scmp.ge.s32.totalorder %s1277_s17, 4   ;;  %s1407_s18 = smov %s1156_s19 }
 0x239   : > { %s1408_s19 = smov %s1160_s20  ;;  %s1409_s20 = smov %s1286_s28 }
 0x23a   : > { %s1410_s21 = smov %s1277_s17  ;;  %21 = sbr.rel (!%p19_p3) target bundleno = 6 (0x6), region = 93 }
 0x23f   :  { %778 = vsyncpa [#allocation3], 1 }
 0x240   :  { %780 = vsyncpa [#allocation3 + $0x1], 1 }
 0x241   :  { %781 = vsyncpa [#allocation6], 1 }
 0x242   :  { %782 = vsyncpa [#allocation4], 1 }
 0x243   :  { %784 = vsyncpa [#allocation4 + $0x1], 1 }

</bundles_post_ra>
